<compile_context>
chip_gen: v7x
topology: tpu7x:2x2x1
jax: 0.10.0
libtpu: 0.0.40
codegen_flags: <defaults>
</compile_context>

<pallas_src>
import jax
import jax.numpy as jnp
import numpy as np
from jax.experimental import pallas as pl
from jax.experimental.pallas import tpu as pltpu

_MIB = 1024 * 1024


def spatial_softmax_kernel(x_ref, xmap_ref, ymap_ref, invt_ref, out_ref):
    # x_ref:    (TILE_NC, HW)  VMEM, native input dtype
    # xmap_ref: (1, HW)        VMEM f32
    # ymap_ref: (1, HW)        VMEM f32
    # invt_ref: (1, 1)         SMEM scalar = 1 / temperature
    # out_ref:  (TILE_NC, 2)   VMEM f32
    #
    # NOTE: rows past NC in a padded last tile contain garbage (exp may give
    # inf/NaN there).  Every op below is row-local and the partial output
    # store is masked, so garbage rows never contaminate valid rows.  Keep it
    # that way if this kernel is ever extended with cross-row ops.
    inv_t = invt_ref[0, 0]
    # Cast to f32 in-kernel; HBM wire traffic stays in the native dtype.
    logits = x_ref[...].astype(jnp.float32) * inv_t
    m = jnp.max(logits, axis=-1, keepdims=True)
    e = jnp.exp(logits - m)                                      # (TILE_NC, HW)
    denom = jnp.sum(e, axis=-1, keepdims=True)                   # (TILE_NC, 1)
    sx = jnp.sum(e * xmap_ref[...], axis=-1, keepdims=True)      # (TILE_NC, 1)
    sy = jnp.sum(e * ymap_ref[...], axis=-1, keepdims=True)      # (TILE_NC, 1)
    out_ref[...] = jnp.concatenate([sx, sy], axis=-1) / denom    # [E[x], E[y]]


def make_maps(num_rows: int, num_cols: int):
    """Reproduce the module buffers:
    torch.meshgrid(linspace(-1,1,num_cols), linspace(-1,1,num_rows), indexing='ij')."""
    a = jnp.linspace(-1.0, 1.0, num_cols)
    b = jnp.linspace(-1.0, 1.0, num_rows)
    grid_x, grid_y = jnp.meshgrid(a, b, indexing="ij")  # both (num_cols, num_rows)
    x_map = grid_x.reshape(-1)
    y_map = grid_y.reshape(-1)
    return x_map.astype(jnp.float32), y_map.astype(jnp.float32)


def _vmem_plan():
    """Generation-aware per-TensorCore VMEM plan.

    Returns (vmem_limit_bytes, small_vmem).  v5e/v6e have 128 MiB of VMEM per
    core; v7x has 64 MiB (and 2 TensorCores per chip).  Unknown hardware falls
    back to the conservative (v7x-safe) plan.
    """
    vmem_capacity = None
    try:
        info = pltpu.get_tpu_info()
        vmem_capacity = int(getattr(info, "vmem_capacity_bytes", 0)) or None
    except Exception:
        vmem_capacity = None
    if vmem_capacity is None or vmem_capacity <= 64 * _MIB:
        return 48 * _MIB, True      # v7x (or unknown): stay well under 64 MiB
    return 96 * _MIB, False         # v5e / v6e: plenty of headroom under 128 MiB


def _choose_tile_nc(nc, hw, itemsize, vmem_limit_bytes, want_two_steps):
    """Largest row tile (multiple of the dtype's native sublane count) whose
    VMEM footprint -- 2x double-buffered input tile in the native dtype plus
    ~2x f32 intermediates (logits, e) -- stays within ~70% of the scoped VMEM
    limit.  Optionally capped so the grid has >= 2 steps (v7x megacore)."""
    sublane = max(8, 32 // max(1, itemsize))          # 8 f32, 16 bf16, 32 int8/fp8
    bytes_per_row = hw * (2 * itemsize + 2 * 4)
    budget = int(0.70 * vmem_limit_bytes)
    rows = budget // max(1, bytes_per_row)
    rows = max(sublane, (rows // sublane) * sublane)
    nc_padded = ((nc + sublane - 1) // sublane) * sublane
    rows = min(rows, nc_padded)
    if want_two_steps and nc_padded > sublane:
        half = (((nc_padded + 1) // 2) + sublane - 1) // sublane * sublane
        rows = min(rows, half)
    return rows


def spatial_softmax(x, x_map, y_map, temperature):
    n, c, h, w = x.shape            # NCHW, like the PyTorch module
    nc, hw = n * c, h * w
    x2 = x.reshape(nc, hw)          # keep native dtype; cast happens in-kernel
    xm = jnp.asarray(x_map, jnp.float32).reshape(1, hw)
    ym = jnp.asarray(y_map, jnp.float32).reshape(1, hw)
    inv_t = (1.0 / jnp.asarray(temperature, jnp.float32)).reshape(1, 1)

    vmem_limit, small_vmem = _vmem_plan()
    tile_nc = _choose_tile_nc(nc, hw, jnp.dtype(x2.dtype).itemsize,
                              vmem_limit, want_two_steps=small_vmem)
    grid = (pl.cdiv(nc, tile_nc),)

    out = pl.pallas_call(
        spatial_softmax_kernel,
        out_shape=jax.ShapeDtypeStruct((nc, 2), jnp.float32),
        grid=grid,
        in_specs=[
            pl.BlockSpec((tile_nc, hw), lambda i: (i, 0)),        # row tiles
            pl.BlockSpec((1, hw), lambda i: (0, 0)),              # resident x_map
            pl.BlockSpec((1, hw), lambda i: (0, 0)),              # resident y_map
            pl.BlockSpec(memory_space=pltpu.MemorySpace.SMEM),    # 1/T scalar
        ],
        out_specs=pl.BlockSpec((tile_nc, 2), lambda i: (i, 0)),
        compiler_params=pltpu.CompilerParams(
            dimension_semantics=("parallel",),   # shard row tiles over TCs (v7x)
            vmem_limit_bytes=vmem_limit,
        ),
    )(x2, xm, ym, inv_t)

    return out.reshape(n, c * 2)    # interleaved [x0, y0, x1, y1, ...]


def spatial_softmax_ref(x, x_map, y_map, temperature):
    """Pure-JAX reference mirroring the PyTorch forward, for correctness."""
    n, c, h, w = x.shape
    xf = x.reshape(-1, h * w).astype(jnp.float32) / temperature
    attn = jax.nn.softmax(xf, axis=1)
    ex = jnp.sum(x_map[None, :] * attn, axis=1, keepdims=True)
    ey = jnp.sum(y_map[None, :] * attn, axis=1, keepdims=True)
    return jnp.concatenate([ex, ey], axis=1).reshape(-1, c * 2)


if __name__ == "__main__":
    # Small shapes consistent with the module: batch=2, channels=4, spatial 16x16.
    n, c, h, w = 2, 4, 16, 16
    key = jax.random.PRNGKey(0)
    x = jax.random.normal(key, (n, c, h, w), dtype=jnp.float32)

    # Module params / buffers, deterministically initialized:
    # learnable temperature = ones(1) (its default init), x_map / y_map buffers.
    temperature = 1.0
    x_map, y_map = make_maps(num_rows=h, num_cols=w)

    out = spatial_softmax(x, x_map, y_map, temperature)
    out = jax.block_until_ready(out)

    ref = spatial_softmax_ref(x, x_map, y_map, temperature)
    np.testing.assert_allclose(np.asarray(out), np.asarray(ref), rtol=1e-5, atol=1e-5)
    assert out.shape == (n, c * 2)

    print("KERNEL_OK")
</pallas_src>

<mosaic_0001>
module attributes {stable_mosaic.version = 11 : i64} {
  func.func @spatial_softmax_kernel(%arg0: i32, %arg1: memref<8x256xf32, #tpu.memory_space<vmem>>, %arg2: memref<1x256xf32, #tpu.memory_space<vmem>>, %arg3: memref<1x256xf32, #tpu.memory_space<vmem>>, %arg4: memref<1x1xf32, #tpu.memory_space<smem>>, %arg5: memref<8x2xf32, #tpu.memory_space<vmem>>) attributes {dimension_semantics = [#tpu.dimension_semantics<parallel>], iteration_bounds = array<i64: 1>, scalar_prefetch = 0 : i64, scratch_operands = 0 : i64, tpu.core_type = #tpu.core_type<tc>, window_params = [{transform_indices = @transform_0, window_bounds = array<i64: 8, 256>}, {pipeline_mode = #tpu.pipeline_mode<synchronous>, transform_indices = @transform_1, window_bounds = array<i64: 1, 256>}, {pipeline_mode = #tpu.pipeline_mode<synchronous>, transform_indices = @transform_2, window_bounds = array<i64: 1, 256>}, {transform_indices = @transform_3, window_bounds = array<i64: 1, 1>}, {transform_indices = @transform_4, window_bounds = array<i64: 8, 2>}]} {
    %c0 = arith.constant 0 : index
    %c0_0 = arith.constant 0 : index
    %0 = memref.load %arg4[%c0, %c0_0] : memref<1x1xf32, #tpu.memory_space<smem>>
    %c0_1 = arith.constant 0 : index
    %c0_2 = arith.constant 0 : index
    %1 = vector.load %arg1[%c0_1, %c0_2] : memref<8x256xf32, #tpu.memory_space<vmem>>, vector<8x256xf32>
    %2 = vector.broadcast %0 : f32 to vector<8x256xf32>
    %3 = arith.mulf %1, %2 : vector<8x256xf32>
    %cst = arith.constant dense<0xFF800000> : vector<8xf32>
    %4 = vector.multi_reduction <maximumf>, %3, %cst [1] : vector<8x256xf32> to vector<8xf32>
    %5 = vector.shape_cast %4 : vector<8xf32> to vector<8x1xf32>
    %6 = vector.broadcast %5 : vector<8x1xf32> to vector<8x256xf32>
    %7 = arith.subf %3, %6 : vector<8x256xf32>
    %8 = math.exp %7 : vector<8x256xf32>
    %cst_3 = arith.constant dense<0.000000e+00> : vector<8xf32>
    %9 = vector.multi_reduction <add>, %8, %cst_3 [1] : vector<8x256xf32> to vector<8xf32>
    %10 = vector.shape_cast %9 : vector<8xf32> to vector<8x1xf32>
    %c0_4 = arith.constant 0 : index
    %c0_5 = arith.constant 0 : index
    %11 = vector.load %arg2[%c0_4, %c0_5] : memref<1x256xf32, #tpu.memory_space<vmem>>, vector<1x256xf32>
    %12 = vector.broadcast %11 : vector<1x256xf32> to vector<8x256xf32>
    %13 = arith.mulf %8, %12 : vector<8x256xf32>
    %cst_6 = arith.constant dense<0.000000e+00> : vector<8xf32>
    %14 = vector.multi_reduction <add>, %13, %cst_6 [1] : vector<8x256xf32> to vector<8xf32>
    %15 = vector.shape_cast %14 : vector<8xf32> to vector<8x1xf32>
    %c0_7 = arith.constant 0 : index
    %c0_8 = arith.constant 0 : index
    %16 = vector.load %arg3[%c0_7, %c0_8] : memref<1x256xf32, #tpu.memory_space<vmem>>, vector<1x256xf32>
    %17 = vector.broadcast %16 : vector<1x256xf32> to vector<8x256xf32>
    %18 = arith.mulf %8, %17 : vector<8x256xf32>
    %cst_9 = arith.constant dense<0.000000e+00> : vector<8xf32>
    %19 = vector.multi_reduction <add>, %18, %cst_9 [1] : vector<8x256xf32> to vector<8xf32>
    %20 = vector.shape_cast %19 : vector<8xf32> to vector<8x1xf32>
    %21 = tpu.concatenate %15, %20 in 1 : vector<8x1xf32>, vector<8x1xf32> -> vector<8x2xf32>
    %22 = vector.broadcast %10 : vector<8x1xf32> to vector<8x2xf32>
    %23 = arith.divf %21, %22 : vector<8x2xf32>
    %c0_10 = arith.constant 0 : index
    %c0_11 = arith.constant 0 : index
    %24 = vector.load %arg5[%c0_10, %c0_11] : memref<8x2xf32, #tpu.memory_space<vmem>>, vector<8x2xf32>
    tpu.vector_store %arg5[%c0_10, %c0_11], %23 {strides = array<i32>} : memref<8x2xf32, #tpu.memory_space<vmem>>, vector<8x2xf32>,
    return
  }
  func.func @transform_0(%arg0: i32) -> (i32, i32) {
    %c0_i32 = arith.constant 0 : i32
    %c0_i32_0 = arith.constant 0 : i32
    return %arg0, %c0_i32 : i32, i32
  }
  func.func @transform_1(%arg0: i32) -> (i32, i32) {
    %c0_i32 = arith.constant 0 : i32
    %c0_i32_0 = arith.constant 0 : i32
    %c0_i32_1 = arith.constant 0 : i32
    return %c0_i32, %c0_i32_0 : i32, i32
  }
  func.func @transform_2(%arg0: i32) -> (i32, i32) {
    %c0_i32 = arith.constant 0 : i32
    %c0_i32_0 = arith.constant 0 : i32
    %c0_i32_1 = arith.constant 0 : i32
    return %c0_i32, %c0_i32_0 : i32, i32
  }
  func.func @transform_3(%arg0: i32) -> (i32, i32) {
    %c0_i32 = arith.constant 0 : i32
    %c0_i32_0 = arith.constant 0 : i32
    %c0_i32_1 = arith.constant 0 : i32
    return %c0_i32, %c0_i32_0 : i32, i32
  }
  func.func @transform_4(%arg0: i32) -> (i32, i32) {
    %c0_i32 = arith.constant 0 : i32
    %c0_i32_0 = arith.constant 0 : i32
    return %arg0, %c0_i32 : i32, i32
  }
}

</mosaic_0001>

<bundles_post_ra>
// kernel: tpu_custom_call.1
= control target key start
LH: loop header
LB: loop body
LE: loop exit
PB: predicated region body
PF: predicated region fallthrough
CT: control target
= control target key end

     0   :  { %10 = vsyncpa [#allocation4], 0  ;;  %s124_s15 = smov [#allocation3]   ;;  %s174_s0 = inlined_call_operand.hbm [shape: f32[8,256], index: 0, kind: input, shape index: {}]   ;;  %s175_s1 = inlined_call_operand.vmem [shape: f32[1,256], index: 1, kind: input, shape index: {}]   ;;  %s176_s2 = inlined_call_operand.vmem [shape: f32[1,256], index: 2, kind: input, shape index: {}]   ;;  %s177_s3 = inlined_call_operand.<no memory space> [shape: f32[1,1], index: 3, kind: input, shape index: {}]   ;;  %s178_s4 = inlined_call_operand.vmem [shape: f32[8,2], index: 4, kind: output, shape index: {}]  }
   0x1   :  { %s17_s16 = sshll.u32 %s124_s15, 4  ;;  %s100_s19 = scalar_lea.hbm %s174_s0, 256  ;;  %s18_s16 = int_to_ptr.vmem [resolvable:$true] %s17_s16 }
   0x2   :  { %p101_p0 = scmp.ne.s32.totalorder %s174_s0, %s100_s19  ;;  %p104_p1 = scmp.lt.u32.totalorder %s100_s19, %s174_s0 }
   0x4   :  { %p106_p2 = pnand %p104_p1, %p101_p0 }
   0x6   :  { %109 = shalt.err (!%p106_p2)
}
   0x7   :  { %s110_s24 = scalar_lea.vmem %s18_s16, 256  ;;  %p115_p4 = scmp.lt.s32.totalorder %s18_s16, %s18_s16 }
   0x8   :  { %p111_p3 = scmp.ne.s32.totalorder %s18_s16, %s110_s24  ;;  %p116_p5 = scmp.lt.s32.totalorder %s110_s24, %s110_s24 }
   0xa   :  { %p117_p6 = por %p116_p5, %p115_p4 }
   0xc   :  { %p118_p7 = pnand %p117_p6, %p111_p3 }
   0xe   :  { %121 = shalt.err (!%p118_p7)
}
   0xf   :  { %20 = dma.hbm_to_vmem [thread:$0]  %s174_s0, 256, %s18_s16, [#allocation4]  }
  0x10   :  { %122 = dma.done.wait [#allocation4], 256  }
  0x11   :  { %123 = vsyncadd [#allocation4], 4294967040  ;;  %v33_v0 = vstv %s177_s3  ;;  %v31_v1 = vld [vmem:[#allocation3] sm:$0xff]  ;;  %v32_v2 = vld [vmem:[#allocation3 + $0x8] sm:$0xff]  ;;  %v50_v7 = vlaneseq  ;;  %vm82_vm0 = vcmask 7168   ;;  %vm86_vm1 = vcmask 15360  }
  0x12   :  { %v34_v3 = vmul.f32 %v33_v0, %v31_v1  ;;  %v35_v4 = vmul.f32 %v33_v0, %v32_v2  ;;  %v48_v14 = vld [vmem:[%s175_s1] sm:$0x3] }
  0x13   :  { %v51_v12 = vshrl.u32 %v50_v7, 7  ;;  %v65_v17 = vld [vmem:[%s176_s2] sm:$0x3] }
  0x14   :  { %v36_v5 = vmax.f32 %v34_v3, %v35_v4 }
  0x15   :  { %v52_v13 = vsub.s32 0, %v51_v12  ;;  %v56_v15 = vsub.s32 1, %v51_v12 }
  0x16   :  { %37 = vmax.xlane.f32.xlu0 %v36_v5 }
  0x17   :  { %v53_v16 = vrot.slane %v48_v14, %v52_v13  ;;  %v57_v18 = vrot.slane %v48_v14, %v56_v15  ;;  %v70_v20 = vrot.slane %v65_v17, %v52_v13  ;;  %v74_v21 = vrot.slane %v65_v17, %v56_v15 }
  0xa3   :  { %v38_v6 = vpop.xlane.xlu0 %37 }
  0xa4   :  { %v39_v8 = vsub.f32 %v34_v3, %v38_v6  ;;  %v40_v9 = vsub.f32 %v35_v4, %v38_v6 }
  0xa6   :  { %v41_v10 = vmul.f32 1.442695, %v39_v8  ;;  %v43_v11 = vmul.f32 1.442695, %v40_v9 }
  0xa8   :  { %94 = vpow2.f32 %v41_v10 }
  0xa9   :  { %96 = vpow2.f32 %v43_v11 }
  0xb2   :  { %v95_v19 = vpop.eup %94 }
  0xb3   :  { %v97_v22 = vpop.eup %96  ;;  %v60_v23 = vmul.f32 %v95_v19, %v53_v16  ;;  %v77_v27 = vmul.f32 %v95_v19, %v70_v20 }
  0xb4   :  { %v45_v24 = vadd.f32 %v97_v22, %v95_v19  ;;  %v61_v25 = vmul.f32 %v97_v22, %v57_v18  ;;  %v78_v28 = vmul.f32 %v97_v22, %v74_v21 }
  0xb6   :  { %46 = vadd.xlane.f32.xlu0 %v45_v24  ;;  %v62_v26 = vadd.f32 %v61_v25, %v60_v23  ;;  %v79_v29 = vadd.f32 %v78_v28, %v77_v27 }
  0xb8   :  { %63 = vadd.xlane.f32.xlu1 %v62_v26 }
  0xbc   :  { %80 = vadd.xlane.f32.xlu1 %v79_v29 }
 0x143   :  { %v47_v30 = vpop.xlane.xlu0 %46 }
 0x144   :  { %98 = vrcp.f32 %v47_v30 }
 0x145   :  { %v64_v31 = vpop.xlane.xlu1 %63 }
 0x149   :  { %v81_v32 = vpop.xlane.xlu1 %80 }
 0x14a   :  { %v83_v34 = vsel %vm82_vm0, %v64_v31, %v81_v32 }
 0x14e   :  { %v99_v33 = vpop.eup %98 }
 0x14f   :  { %v85_v35 = vmul.f32 %v99_v33, %v83_v34 }
 0x151   :  { %87 = vst.msk [vmem:[%s178_s4] sm:$0xff] %vm86_vm1, %v85_v35 }
 0x152   :  { %92 = vsyncpa [#allocation4], 1 }

</bundles_post_ra>
